<compile_context>
chip_gen: v6e
topology: v6e:2x2x1
jax: 0.10.0
libtpu: 0.0.40
codegen_flags: <defaults>
</compile_context>

<pallas_src>
import functools

import jax
import jax.numpy as jnp
from jax.experimental import pallas as pl
from jax.experimental.pallas import tpu as pltpu


D_HIDDEN = 32
N_HEAD = 4   # TODO(synk): GNNlayer source (multi-head top-k attention, leaky-ReLU
             # scoring, input/feat/attn dropout) was not provided; a degree-normalised
             # (src-entity + relation) message with an alpha residual stands in, so
             # heads are not materialised.
ALPHA = 0.05

LANE_PACK = 128 // D_HIDDEN        # 4 logical rows packed per 128-wide lane row
PACKED_D = D_HIDDEN * LANE_PACK    # 128

# 512 packed rows == 2048 logical rows per grid step.  Measured streaming
# scaling on v6e: ~63% of HBM roofline at tile 256 -> ~85% at 512-1024, and the
# ~0.35 us per-grid-step overhead amortises (review item 1).
MAX_ROW_TILE = 512

# bf16 matmul operands on every generation: the MXU is bf16-native with f32
# accumulation on v5e, v6e and v7x alike.  The old "f32-only VPU on v5e" caveat
# only constrains elementwise VPU ops, which stay in f32 here (bias/ReLU/adds and
# all accumulation are f32); the one-hot gather/scatter matmuls also stay f32 so
# gather/scatter remain exact (review item 5).
MATMUL_DTYPE = jnp.bfloat16

# Per-step tiles use ~1.5 MiB even at MAX_ROW_TILE with double buffering, so
# 32 MiB leaves ample headroom; v7x guidance is to stay <= ~48 MiB of its
# 64 MiB/TC (review item 7).
_VMEM_LIMIT_BYTES = 32 * 1024 * 1024

# Fused path only when its VMEM footprint (dominated by the one-hot
# gather/scatter matrices) stays well below the smallest per-TC VMEM (v7x: 64 MiB).
_FUSED_VMEM_BUDGET = 12 * 1024 * 1024


# --------------------------- small helpers ---------------------------

def _round_up(x, m):
    return (x + m - 1) // m * m


def _pack_rows(x):
    """[R, d] -> [ceil(R/LANE_PACK), d*LANE_PACK] (zero-pads the row tail)."""
    r, d = x.shape
    rp = _round_up(r, LANE_PACK)
    if rp != r:
        x = jnp.pad(x, ((0, rp - r), (0, 0)))
    return x.reshape(rp // LANE_PACK, d * LANE_PACK)


def _unpack_rows(xp, r, d):
    return xp.reshape(-1, d)[:r]


def _block_diag(w):
    """W [k, n] -> block_diag(W, ..., W) [k*LANE_PACK, n*LANE_PACK]."""
    return jnp.kron(jnp.eye(LANE_PACK, dtype=w.dtype), w)


def _tile_bias(b):
    return jnp.tile(b, LANE_PACK).reshape(1, -1).astype(jnp.float32)


def _row_grid(packed_rows):
    # Prefer >= 2 grid steps so v7x's two TensorCores both get work under
    # dimension_semantics=("parallel",) (review item 6); cap at MAX_ROW_TILE.
    tile = min(MAX_ROW_TILE, max(8, _round_up(pl.cdiv(packed_rows, 2), 8)))
    return tile, (pl.cdiv(packed_rows, tile),)


# =====================================================================
# Streaming path: lane-packed row-tiled projection kernels (large graphs)
# =====================================================================

def _packed_linear_kernel(x_ref, w_ref, b_ref, o_ref):
    # y = x @ block_diag(W) + tile(b)  ==  row-packed (x @ W + b)
    y = jnp.dot(x_ref[...], w_ref[...], preferred_element_type=jnp.float32)
    o_ref[...] = y + b_ref[...]


def packed_linear(x, w, b):
    """y = x @ w + b with a row-tiled, lane-packed (128-wide) Pallas kernel."""
    r, d = x.shape
    xp = _pack_rows(x).astype(MATMUL_DTYPE)          # [rp, 128] bf16 (halves HBM read)
    wp = _block_diag(w).astype(MATMUL_DTYPE)         # [128, 128]
    bp = _tile_bias(b)                               # [1, 128] f32
    rp = xp.shape[0]
    tile, grid = _row_grid(rp)
    in_bytes = jnp.dtype(MATMUL_DTYPE).itemsize
    row_spec = pl.BlockSpec((tile, PACKED_D), lambda i: (i, 0))
    # Weights / bias map to block (0, 0) on every step -> DMA'd once, VMEM-resident.
    w_spec = pl.BlockSpec((PACKED_D, PACKED_D), lambda i: (0, 0))
    b_spec = pl.BlockSpec((1, PACKED_D), lambda i: (0, 0))
    yp = pl.pallas_call(
        _packed_linear_kernel,
        out_shape=jax.ShapeDtypeStruct((rp, PACKED_D), jnp.float32),
        grid=grid,
        in_specs=[row_spec, w_spec, b_spec],
        out_specs=row_spec,
        compiler_params=pltpu.CompilerParams(
            dimension_semantics=("parallel",),
            vmem_limit_bytes=_VMEM_LIMIT_BYTES),
        # Correct (packed / block-diagonal) MXU work and 128-wide weight bytes,
        # not the logical d=32 sizes (review item 8).
        cost_estimate=pl.CostEstimate(
            flops=2 * rp * PACKED_D * PACKED_D,
            transcendentals=0,
            bytes_accessed=(rp * PACKED_D * (in_bytes + 4)
                            + PACKED_D * PACKED_D * in_bytes + PACKED_D * 4)),
    )(xp, wp, bp)
    return _unpack_rows(yp, r, d)


def _triplet_ent_kernel(head_ref, edge_ref, end_ref,
                        wth_ref, wte_ref, wtn_ref, bt_ref,
                        we_ref, be_ref, o_ref):
    # TripletEmbedding (concat-free: three K=128 dots) fused with the second GNN
    # layer's entity projection, so triple_h never hits HBM.  Single fused
    # expression, no VMEM scratch intermediates (v5e has 1 vst slot/bundle).
    t = jnp.dot(head_ref[...], wth_ref[...], preferred_element_type=jnp.float32)
    t = t + jnp.dot(edge_ref[...], wte_ref[...], preferred_element_type=jnp.float32)
    t = t + jnp.dot(end_ref[...], wtn_ref[...], preferred_element_type=jnp.float32)
    t = jnp.maximum(t + bt_ref[...], 0.0)                      # ReLU of TripletEmbedding
    h = jnp.dot(t.astype(we_ref.dtype), we_ref[...], preferred_element_type=jnp.float32)
    o_ref[...] = h + be_ref[...]


def packed_triplet_ent(head_h, edge_h, end_h, w_t, b_t, w_ent, b_ent):
    """h2 = relu(head@Wt_h + edge@Wt_e + end@Wt_n + b_t) @ W_ent + b_ent.

    The [E, 3d] concat of the previous version is gone: the three operands are
    streamed separately (same read bytes as the concat, but its extra HBM
    write+read is removed -- review item 2).
    """
    e, d = head_h.shape
    headp = _pack_rows(head_h).astype(MATMUL_DTYPE)
    edgep = _pack_rows(edge_h).astype(MATMUL_DTYPE)
    endp = _pack_rows(end_h).astype(MATMUL_DTYPE)
    wth = _block_diag(w_t[:d]).astype(MATMUL_DTYPE)
    wte = _block_diag(w_t[d:2 * d]).astype(MATMUL_DTYPE)
    wtn = _block_diag(w_t[2 * d:]).astype(MATMUL_DTYPE)
    btp = _tile_bias(b_t)
    wep = _block_diag(w_ent).astype(MATMUL_DTYPE)
    bep = _tile_bias(b_ent)
    rp = headp.shape[0]
    tile, grid = _row_grid(rp)
    in_bytes = jnp.dtype(MATMUL_DTYPE).itemsize
    row_spec = pl.BlockSpec((tile, PACKED_D), lambda i: (i, 0))
    w_spec = pl.BlockSpec((PACKED_D, PACKED_D), lambda i: (0, 0))
    b_spec = pl.BlockSpec((1, PACKED_D), lambda i: (0, 0))
    # TODO(synk): if profiling shows exposed DMA on short grids, sweep
    # pipeline_mode=pl.Buffered(3) on the three row specs (review item 9).
    hp = pl.pallas_call(
        _triplet_ent_kernel,
        out_shape=jax.ShapeDtypeStruct((rp, PACKED_D), jnp.float32),
        grid=grid,
        in_specs=[row_spec, row_spec, row_spec,
                  w_spec, w_spec, w_spec, b_spec, w_spec, b_spec],
        out_specs=row_spec,
        compiler_params=pltpu.CompilerParams(
            dimension_semantics=("parallel",),
            vmem_limit_bytes=_VMEM_LIMIT_BYTES),
        cost_estimate=pl.CostEstimate(
            flops=2 * rp * PACKED_D * PACKED_D * 4,
            transcendentals=0,
            bytes_accessed=(rp * PACKED_D * (3 * in_bytes + 4)
                            + 4 * PACKED_D * PACKED_D * in_bytes
                            + 2 * PACKED_D * 4)),
    )(headp, edgep, endp, wth, wte, wtn, btp, wep, bep)
    return _unpack_rows(hp, e, d)


def gnn_propagate(src, dst, num_nodes, h, r, alpha=ALPHA):
    """Stand-in message passing on pre-projected entity (h) / relation (r) features.

    TODO(synk): the reference GNNlayer's multi-head top-k attention, leaky-ReLU
    scoring and dropout were not provided; degree-normalised (src-entity +
    relation) messages with an alpha residual are used instead.
    TODO(synk): on the streaming (large-graph) path this scatter-add still runs
    in XLA; pre-sort edges by dst and do the segment-sum in Pallas with
    scalar-prefetched segment offsets (PrefetchScalarGridSpec) to remove the
    remaining HBM round trips (small graphs already take the fused Pallas path).
    """
    msgs = h[src] + r
    agg = jnp.zeros((num_nodes, h.shape[1]), jnp.float32).at[dst].add(msgs)
    deg = jnp.zeros((num_nodes, 1), jnp.float32).at[dst].add(1.0)
    agg = agg / jnp.maximum(deg, 1.0)
    return (1.0 - alpha) * agg + alpha * h


def gnn_block_forward_streaming(params, g1, g2, node_feat, len_h, angle_h):
    """Row-tiled streaming path (large graphs)."""
    src1, dst1 = g1
    src2, dst2 = g2
    n_atoms = node_feat.shape[0]
    n_bonds = len_h.shape[0]
    p1, p2, pt = params["gnn1"], params["gnn2"], params["triplet"]

    # GNN layer 1 (atom-atom graph): Pallas projections, XLA scatter glue.
    h1 = packed_linear(node_feat, p1["w_ent"], p1["b_ent"])          # (N, d)
    r1 = packed_linear(len_h, p1["w_rel"], p1["b_rel"])              # (E1, d)
    g1_out = jnp.maximum(gnn_propagate(src1, dst1, n_atoms, h1, r1), 0.0)

    # TripletEmbedding fused with GNN layer 2's entity projection (no concat).
    head_h, end_h = g1_out[src1], g1_out[dst1]
    h2 = packed_triplet_ent(head_h, len_h, end_h,
                            pt["w"], pt["b"], p2["w_ent"], p2["b_ent"])  # (E1, d)

    # GNN layer 2 (bond-bond graph).
    r2 = packed_linear(angle_h, p2["w_rel"], p2["b_rel"])            # (E2, d)
    g2_out = jnp.maximum(gnn_propagate(src2, dst2, n_bonds, h2, r2), 0.0)
    return g1_out, g2_out


# =====================================================================
# Fused path: whole GNNBlock forward in one VMEM-resident pallas_call
# =====================================================================

def _fused_gnn_block_kernel(nf_ref, lh_ref, ah_ref,
                            src1_ref, dst1c_ref, dst1r_ref, src2_ref, dst2r_ref,
                            w_ref, b_ref, g1o_ref, g2o_ref):
    f32 = jnp.float32
    np_ = nf_ref.shape[0]
    e1p = lh_ref.shape[0]

    def proj(x, wi, bi):
        return (jnp.dot(x, w_ref[wi], preferred_element_type=f32)
                + b_ref[bi:bi + 1, :])

    def onehot_rows(idx_col, n_cols):
        # one_hot[e, n] = (idx[e] == n): left-multiplying gathers rows.
        rows = idx_col.shape[0]
        return (idx_col == jax.lax.broadcasted_iota(jnp.int32, (rows, n_cols), 1)
                ).astype(f32)

    def onehot_cols(idx_row, n_rows):
        # one_hot[n, e] = (idx[e] == n): left-multiplying scatter-adds edge rows.
        cols = idx_row.shape[1]
        return (idx_row == jax.lax.broadcasted_iota(jnp.int32, (n_rows, cols), 0)
                ).astype(f32)

    # ---- GNN layer 1 (atom-atom graph) ----
    h1 = proj(nf_ref[...], 0, 0)                       # (Np, d) f32
    r1 = proj(lh_ref[...], 1, 1)                       # (E1p, d) f32
    gat_src1 = onehot_rows(src1_ref[...], np_)         # (E1p, Np)
    gat_dst1 = onehot_rows(dst1c_ref[...], np_)        # (E1p, Np)
    sct_dst1 = onehot_cols(dst1r_ref[...], np_)        # (Np, E1p)
    msgs1 = jnp.dot(gat_src1, h1, preferred_element_type=f32) + r1
    deg1 = jnp.sum(sct_dst1, axis=1, keepdims=True)
    agg1 = jnp.dot(sct_dst1, msgs1, preferred_element_type=f32)
    agg1 = agg1 / jnp.maximum(deg1, 1.0)
    g1_out = jnp.maximum((1.0 - ALPHA) * agg1 + ALPHA * h1, 0.0)
    g1o_ref[...] = g1_out

    # ---- TripletEmbedding (concat-free) fused with GNN layer 2 ent projection ----
    head_h = jnp.dot(gat_src1, g1_out, preferred_element_type=f32)
    end_h = jnp.dot(gat_dst1, g1_out, preferred_element_type=f32)
    t = (jnp.dot(head_h.astype(w_ref.dtype), w_ref[2], preferred_element_type=f32)
         + jnp.dot(lh_ref[...], w_ref[3], preferred_element_type=f32)
         + jnp.dot(end_h.astype(w_ref.dtype), w_ref[4], preferred_element_type=f32)
         + b_ref[2:3, :])
    t = jnp.maximum(t, 0.0)
    h2 = jnp.dot(t.astype(w_ref.dtype), w_ref[5],
                 preferred_element_type=f32) + b_ref[3:4, :]

    # ---- GNN layer 2 (bond-bond graph) ----
    r2 = proj(ah_ref[...], 6, 4)                       # (E2p, d)
    gat_src2 = onehot_rows(src2_ref[...], e1p)         # (E2p, E1p)
    sct_dst2 = onehot_cols(dst2r_ref[...], e1p)        # (E1p, E2p)
    msgs2 = jnp.dot(gat_src2, h2, preferred_element_type=f32) + r2
    deg2 = jnp.sum(sct_dst2, axis=1, keepdims=True)
    agg2 = jnp.dot(sct_dst2, msgs2, preferred_element_type=f32)
    agg2 = agg2 / jnp.maximum(deg2, 1.0)
    g2o_ref[...] = jnp.maximum((1.0 - ALPHA) * agg2 + ALPHA * h2, 0.0)


def _fused_footprint_bytes(n_atoms, n_bonds, n_angles, d):
    np_, e1p, e2p = (_round_up(max(r, 1), 8) for r in (n_atoms, n_bonds, n_angles))
    lane = lambda x: _round_up(x, 128)                 # VMEM lane padding
    onehots = 4 * (3 * e1p * lane(np_) + np_ * lane(e1p)
                   + e2p * lane(e1p) + e1p * lane(e2p))
    feats = 4 * (2 * np_ + 7 * e1p + 2 * e2p) * lane(d)
    weights = 7 * d * lane(d) * jnp.dtype(MATMUL_DTYPE).itemsize + 5 * lane(d) * 4
    return onehots + feats + weights


def fused_gnn_block(params, g1, g2, node_feat, len_h, angle_h):
    """Whole forward in one pallas_call; gather/scatter as one-hot MXU matmuls."""
    src1, dst1 = g1
    src2, dst2 = g2
    n_atoms, d = node_feat.shape
    n_bonds = len_h.shape[0]
    n_angles = angle_h.shape[0]
    np_, e1p, e2p = (_round_up(max(r, 1), 8) for r in (n_atoms, n_bonds, n_angles))

    def pad_rows(x, rp):
        return jnp.pad(x, ((0, rp - x.shape[0]), (0, 0)))

    def pad_idx(idx, rp, sentinel):
        # Padded edges point at an out-of-range node index so their one-hot rows
        # are all-zero: they gather zeros and scatter nowhere.
        return jnp.pad(idx.astype(jnp.int32), (0, rp - idx.shape[0]),
                       constant_values=sentinel)

    nf = pad_rows(node_feat, np_).astype(MATMUL_DTYPE)
    lh = pad_rows(len_h, e1p).astype(MATMUL_DTYPE)
    ah = pad_rows(angle_h, e2p).astype(MATMUL_DTYPE)
    src1p = pad_idx(src1, e1p, np_)
    dst1p = pad_idx(dst1, e1p, np_)
    src2p = pad_idx(src2, e2p, e1p)
    dst2p = pad_idx(dst2, e2p, e1p)

    p1, p2, pt = params["gnn1"], params["gnn2"], params["triplet"]
    wt = pt["w"]                                        # (3d, d), split -> no concat
    w_stack = jnp.stack([p1["w_ent"], p1["w_rel"],
                         wt[:d], wt[d:2 * d], wt[2 * d:],
                         p2["w_ent"], p2["w_rel"]]).astype(MATMUL_DTYPE)   # (7, d, d)
    b_stack = jnp.stack([p1["b_ent"], p1["b_rel"], pt["b"],
                         p2["b_ent"], p2["b_rel"]]).astype(jnp.float32)    # (5, d)

    in_bytes = jnp.dtype(MATMUL_DTYPE).itemsize
    flops = 2 * ((np_ + e1p + e2p) * d * d              # ent1 / rel1 / rel2 projections
                 + 4 * e1p * d * d                      # triplet (3 dots) + ent2 proj
                 + 3 * e1p * np_ * d                    # graph-1 gathers
                 + np_ * e1p * d                        # graph-1 scatter
                 + e2p * e1p * d                        # graph-2 gather
                 + e1p * e2p * d)                       # graph-2 scatter
    bytes_accessed = ((np_ + e1p + e2p) * d * in_bytes
                      + (np_ + e1p) * d * 4
                      + 7 * d * d * in_bytes + 5 * d * 4
                      + (3 * e1p + 2 * e2p) * 4)

    g1o, g2o = pl.pallas_call(
        _fused_gnn_block_kernel,
        out_shape=(jax.ShapeDtypeStruct((np_, d), jnp.float32),
                   jax.ShapeDtypeStruct((e1p, d), jnp.float32)),
        compiler_params=pltpu.CompilerParams(vmem_limit_bytes=_VMEM_LIMIT_BYTES),
        cost_estimate=pl.CostEstimate(flops=flops, transcendentals=0,
                                      bytes_accessed=bytes_accessed),
    )(nf, lh, ah,
      src1p[:, None], dst1p[:, None], dst1p[None, :],   # dst1 in both layouts to avoid
      src2p[:, None], dst2p[None, :],                   # an in-kernel transpose
      w_stack, b_stack)
    return g1o[:n_atoms], g2o[:n_bonds]


# --------------------------- dispatcher ---------------------------

def gnn_block_forward(params, g1, g2, node_feat, len_h, angle_h):
    """Mirrors GNNBlock.forward:
        g1_out        = relu(gnn1(g1, node_feat, len_h))
        head_h, end_h = g1_out[g1.src], g1_out[g1.dst]
        triple_h      = relu(Linear(cat([head_h, len_h, end_h])))
        g2_out        = relu(gnn2(g2, triple_h, angle_h))
    Small/medium graphs take the single fused VMEM-resident kernel; larger ones
    fall back to the row-tiled streaming kernels.
    """
    footprint = _fused_footprint_bytes(node_feat.shape[0], len_h.shape[0],
                                       angle_h.shape[0], node_feat.shape[1])
    if footprint <= _FUSED_VMEM_BUDGET:
        return fused_gnn_block(params, g1, g2, node_feat, len_h, angle_h)
    return gnn_block_forward_streaming(params, g1, g2, node_feat, len_h, angle_h)


# --------------------------- parameters & reference ---------------------------

def init_params(key, d_hidden):
    def glorot(key, shape):
        fan_in = shape[0]
        return jax.random.normal(key, shape, jnp.float32) / jnp.sqrt(fan_in)

    keys = jax.random.split(key, 8)
    gnn1 = dict(
        w_ent=glorot(keys[0], (d_hidden, d_hidden)),
        b_ent=jnp.zeros((d_hidden,), jnp.float32),
        w_rel=glorot(keys[1], (d_hidden, d_hidden)),
        b_rel=jnp.zeros((d_hidden,), jnp.float32),
    )
    gnn2 = dict(
        w_ent=glorot(keys[2], (d_hidden, d_hidden)),
        b_ent=jnp.zeros((d_hidden,), jnp.float32),
        w_rel=glorot(keys[3], (d_hidden, d_hidden)),
        b_rel=jnp.zeros((d_hidden,), jnp.float32),
    )
    triplet = dict(
        w=glorot(keys[4], (3 * d_hidden, d_hidden)),
        b=jnp.zeros((d_hidden,), jnp.float32),
    )
    return dict(gnn1=gnn1, gnn2=gnn2, triplet=triplet)


def reference_forward(params, g1, g2, node_feat, len_h, angle_h):
    """Pure-JAX f32 reference (same math, no Pallas, no bf16 casts)."""
    src1, dst1 = g1
    src2, dst2 = g2
    n_atoms = node_feat.shape[0]
    n_bonds = len_h.shape[0]
    p1, p2, pt = params["gnn1"], params["gnn2"], params["triplet"]
    h1 = node_feat @ p1["w_ent"] + p1["b_ent"]
    r1 = len_h @ p1["w_rel"] + p1["b_rel"]
    g1_out = jnp.maximum(gnn_propagate(src1, dst1, n_atoms, h1, r1), 0.0)
    head_h, end_h = g1_out[src1], g1_out[dst1]
    t = jnp.maximum(jnp.concatenate([head_h, len_h, end_h], -1) @ pt["w"] + pt["b"], 0.0)
    h2 = t @ p2["w_ent"] + p2["b_ent"]
    r2 = angle_h @ p2["w_rel"] + p2["b_rel"]
    g2_out = jnp.maximum(gnn_propagate(src2, dst2, n_bonds, h2, r2), 0.0)
    return g1_out, g2_out


# --------------------------- driver ---------------------------

if __name__ == "__main__":
    key = jax.random.PRNGKey(0)
    k_par, k_nf, k_lh, k_ah, k_e1, k_e2 = jax.random.split(key, 6)

    n_atoms, n_bonds, n_angles = 8, 16, 24

    params = init_params(k_par, D_HIDDEN)
    node_feat = jax.random.normal(k_nf, (n_atoms, D_HIDDEN), jnp.float32)
    len_h = jax.random.normal(k_lh, (n_bonds, D_HIDDEN), jnp.float32)
    angle_h = jax.random.normal(k_ah, (n_angles, D_HIDDEN), jnp.float32)

    # g1: atom-atom graph (n_bonds edges over n_atoms nodes)
    e1 = jax.random.randint(k_e1, (2, n_bonds), 0, n_atoms, jnp.int32)
    g1 = (e1[0], e1[1])
    # g2: bond-bond graph (n_angles edges over n_bonds nodes)
    e2 = jax.random.randint(k_e2, (2, n_angles), 0, n_bonds, jnp.int32)
    g2 = (e2[0], e2[1])

    fwd = jax.jit(functools.partial(gnn_block_forward, params))            # fused path
    fwd_stream = jax.jit(functools.partial(gnn_block_forward_streaming, params))

    g1_out, g2_out = jax.block_until_ready(fwd(g1, g2, node_feat, len_h, angle_h))
    g1_s, g2_s = jax.block_until_ready(fwd_stream(g1, g2, node_feat, len_h, angle_h))

    assert g1_out.shape == (n_atoms, D_HIDDEN)
    assert g2_out.shape == (n_bonds, D_HIDDEN)

    # Validate against the pure-JAX f32 reference (bf16 MXU operands -> loose tol).
    g1_ref, g2_ref = reference_forward(params, g1, g2, node_feat, len_h, angle_h)
    for got1, got2 in ((g1_out, g2_out), (g1_s, g2_s)):
        assert bool(jnp.allclose(got1, g1_ref, rtol=1e-1, atol=1e-1))
        assert bool(jnp.allclose(got2, g2_ref, rtol=1e-1, atol=1e-1))

    print("KERNEL_OK")
</pallas_src>

<mosaic_0001>
module attributes {stable_mosaic.version = 11 : i64} {
  func.func @_fused_gnn_block_kernel(%arg0: memref<8x32xbf16, #tpu.memory_space<vmem>>, %arg1: memref<16x32xbf16, #tpu.memory_space<vmem>>, %arg2: memref<24x32xbf16, #tpu.memory_space<vmem>>, %arg3: memref<16x1xi32, #tpu.memory_space<vmem>>, %arg4: memref<16x1xi32, #tpu.memory_space<vmem>>, %arg5: memref<1x16xi32, #tpu.memory_space<vmem>>, %arg6: memref<24x1xi32, #tpu.memory_space<vmem>>, %arg7: memref<1x24xi32, #tpu.memory_space<vmem>>, %arg8: memref<7x32x32xbf16, #tpu.memory_space<vmem>>, %arg9: memref<5x32xf32, #tpu.memory_space<vmem>>, %arg10: memref<8x32xf32, #tpu.memory_space<vmem>>, %arg11: memref<16x32xf32, #tpu.memory_space<vmem>>) attributes {dimension_semantics = [], scalar_prefetch = 0 : i64, scratch_operands = 0 : i64, tpu.core_type = #tpu.core_type<tc>} {
    %c0 = arith.constant 0 : index
    %c0_0 = arith.constant 0 : index
    %0 = vector.load %arg0[%c0, %c0_0] : memref<8x32xbf16, #tpu.memory_space<vmem>>, vector<8x32xbf16>
    %c0_1 = arith.constant 0 : index
    %c0_2 = arith.constant 0 : index
    %c0_3 = arith.constant 0 : index
    %1 = vector.load %arg8[%c0_1, %c0_2, %c0_3] : memref<7x32x32xbf16, #tpu.memory_space<vmem>>, vector<1x32x32xbf16>
    %2 = vector.shape_cast %1 : vector<1x32x32xbf16> to vector<32x32xbf16>
    %cst = arith.constant dense<0.000000e+00> : vector<8x32xf32>
    %3 = tpu.matmul %0, %2, %cst {dimension_numbers = #tpu.dot_dimension_numbers<[1], [0], [0], [1], [0, 0, 1, 1], [], []>} : vector<8x32xbf16>, vector<32x32xbf16>, vector<8x32xf32> -> vector<8x32xf32>
    %c0_4 = arith.constant 0 : index
    %c0_5 = arith.constant 0 : index
    %4 = vector.load %arg9[%c0_4, %c0_5] : memref<5x32xf32, #tpu.memory_space<vmem>>, vector<1x32xf32>
    %5 = vector.broadcast %4 : vector<1x32xf32> to vector<8x32xf32>
    %6 = arith.addf %3, %5 : vector<8x32xf32>
    %c0_6 = arith.constant 0 : index
    %c0_7 = arith.constant 0 : index
    %7 = vector.load %arg1[%c0_6, %c0_7] : memref<16x32xbf16, #tpu.memory_space<vmem>>, vector<16x32xbf16>
    %c1 = arith.constant 1 : index
    %c0_8 = arith.constant 0 : index
    %c0_9 = arith.constant 0 : index
    %8 = vector.load %arg8[%c1, %c0_8, %c0_9] : memref<7x32x32xbf16, #tpu.memory_space<vmem>>, vector<1x32x32xbf16>
    %9 = vector.shape_cast %8 : vector<1x32x32xbf16> to vector<32x32xbf16>
    %cst_10 = arith.constant dense<0.000000e+00> : vector<16x32xf32>
    %10 = tpu.matmul %7, %9, %cst_10 {dimension_numbers = #tpu.dot_dimension_numbers<[1], [0], [0], [1], [0, 0, 1, 1], [], []>} : vector<16x32xbf16>, vector<32x32xbf16>, vector<16x32xf32> -> vector<16x32xf32>
    %c1_11 = arith.constant 1 : index
    %c0_12 = arith.constant 0 : index
    %11 = vector.load %arg9[%c1_11, %c0_12] : memref<5x32xf32, #tpu.memory_space<vmem>>, vector<1x32xf32>
    %12 = vector.broadcast %11 : vector<1x32xf32> to vector<16x32xf32>
    %13 = arith.addf %10, %12 : vector<16x32xf32>
    %c0_13 = arith.constant 0 : index
    %c0_14 = arith.constant 0 : index
    %14 = vector.load %arg3[%c0_13, %c0_14] : memref<16x1xi32, #tpu.memory_space<vmem>>, vector<16x1xi32>
    %15 = tpu.iota {dimensions = array<i32: 1>} : vector<16x8xi32>
    %16 = vector.broadcast %14 : vector<16x1xi32> to vector<16x8xi32>
    %17 = arith.cmpi eq, %16, %15 : vector<16x8xi32>
    %18 = arith.extui %17 : vector<16x8xi1> to vector<16x8xi32>
    %19 = arith.sitofp %18 : vector<16x8xi32> to vector<16x8xf32>
    %c0_15 = arith.constant 0 : index
    %c0_16 = arith.constant 0 : index
    %20 = vector.load %arg4[%c0_15, %c0_16] : memref<16x1xi32, #tpu.memory_space<vmem>>, vector<16x1xi32>
    %21 = tpu.iota {dimensions = array<i32: 1>} : vector<16x8xi32>
    %22 = vector.broadcast %20 : vector<16x1xi32> to vector<16x8xi32>
    %23 = arith.cmpi eq, %22, %21 : vector<16x8xi32>
    %24 = arith.extui %23 : vector<16x8xi1> to vector<16x8xi32>
    %25 = arith.sitofp %24 : vector<16x8xi32> to vector<16x8xf32>
    %c0_17 = arith.constant 0 : index
    %c0_18 = arith.constant 0 : index
    %26 = vector.load %arg5[%c0_17, %c0_18] : memref<1x16xi32, #tpu.memory_space<vmem>>, vector<1x16xi32>
    %27 = tpu.iota {dimensions = array<i32: 0>} : vector<8x16xi32>
    %28 = vector.broadcast %26 : vector<1x16xi32> to vector<8x16xi32>
    %29 = arith.cmpi eq, %28, %27 : vector<8x16xi32>
    %30 = arith.extui %29 : vector<8x16xi1> to vector<8x16xi32>
    %31 = arith.sitofp %30 : vector<8x16xi32> to vector<8x16xf32>
    %cst_19 = arith.constant dense<0.000000e+00> : vector<16x32xf32>
    %32 = tpu.matmul %19, %6, %cst_19 {dimension_numbers = #tpu.dot_dimension_numbers<[1], [0], [0], [1], [0, 0, 1, 1], [], []>} : vector<16x8xf32>, vector<8x32xf32>, vector<16x32xf32> -> vector<16x32xf32>
    %33 = arith.addf %32, %13 : vector<16x32xf32>
    %cst_20 = arith.constant dense<0.000000e+00> : vector<8xf32>
    %34 = vector.multi_reduction <add>, %31, %cst_20 [1] : vector<8x16xf32> to vector<8xf32>
    %35 = vector.shape_cast %34 : vector<8xf32> to vector<8x1xf32>
    %cst_21 = arith.constant dense<0.000000e+00> : vector<8x32xf32>
    %36 = tpu.matmul %31, %33, %cst_21 {dimension_numbers = #tpu.dot_dimension_numbers<[1], [0], [0], [1], [0, 0, 1, 1], [], []>} : vector<8x16xf32>, vector<16x32xf32>, vector<8x32xf32> -> vector<8x32xf32>
    %cst_22 = arith.constant 1.000000e+00 : f32
    %37 = vector.broadcast %cst_22 : f32 to vector<8x1xf32>
    %38 = arith.maximumf %35, %37 : vector<8x1xf32>
    %39 = vector.broadcast %38 : vector<8x1xf32> to vector<8x32xf32>
    %40 = arith.divf %36, %39 : vector<8x32xf32>
    %cst_23 = arith.constant 0.949999988 : f32
    %41 = vector.broadcast %cst_23 : f32 to vector<8x32xf32>
    %42 = arith.mulf %41, %40 : vector<8x32xf32>
    %cst_24 = arith.constant 5.000000e-02 : f32
    %43 = vector.broadcast %cst_24 : f32 to vector<8x32xf32>
    %44 = arith.mulf %43, %6 : vector<8x32xf32>
    %45 = arith.addf %42, %44 : vector<8x32xf32>
    %cst_25 = arith.constant 0.000000e+00 : f32
    %46 = vector.broadcast %cst_25 : f32 to vector<8x32xf32>
    %47 = arith.maximumf %45, %46 : vector<8x32xf32>
    %c0_26 = arith.constant 0 : index
    %c0_27 = arith.constant 0 : index
    %48 = vector.load %arg10[%c0_26, %c0_27] : memref<8x32xf32, #tpu.memory_space<vmem>>, vector<8x32xf32>
    tpu.vector_store %arg10[%c0_26, %c0_27], %47 {strides = array<i32>} : memref<8x32xf32, #tpu.memory_space<vmem>>, vector<8x32xf32>,
    %cst_28 = arith.constant dense<0.000000e+00> : vector<16x32xf32>
    %49 = tpu.matmul %19, %47, %cst_28 {dimension_numbers = #tpu.dot_dimension_numbers<[1], [0], [0], [1], [0, 0, 1, 1], [], []>} : vector<16x8xf32>, vector<8x32xf32>, vector<16x32xf32> -> vector<16x32xf32>
    %cst_29 = arith.constant dense<0.000000e+00> : vector<16x32xf32>
    %50 = tpu.matmul %25, %47, %cst_29 {dimension_numbers = #tpu.dot_dimension_numbers<[1], [0], [0], [1], [0, 0, 1, 1], [], []>} : vector<16x8xf32>, vector<8x32xf32>, vector<16x32xf32> -> vector<16x32xf32>
    %51 = arith.truncf %49 : vector<16x32xf32> to vector<16x32xbf16>
    %c2 = arith.constant 2 : index
    %c0_30 = arith.constant 0 : index
    %c0_31 = arith.constant 0 : index
    %52 = vector.load %arg8[%c2, %c0_30, %c0_31] : memref<7x32x32xbf16, #tpu.memory_space<vmem>>, vector<1x32x32xbf16>
    %53 = vector.shape_cast %52 : vector<1x32x32xbf16> to vector<32x32xbf16>
    %cst_32 = arith.constant dense<0.000000e+00> : vector<16x32xf32>
    %54 = tpu.matmul %51, %53, %cst_32 {dimension_numbers = #tpu.dot_dimension_numbers<[1], [0], [0], [1], [0, 0, 1, 1], [], []>} : vector<16x32xbf16>, vector<32x32xbf16>, vector<16x32xf32> -> vector<16x32xf32>
    %c0_33 = arith.constant 0 : index
    %c0_34 = arith.constant 0 : index
    %55 = vector.load %arg1[%c0_33, %c0_34] : memref<16x32xbf16, #tpu.memory_space<vmem>>, vector<16x32xbf16>
    %c3 = arith.constant 3 : index
    %c0_35 = arith.constant 0 : index
    %c0_36 = arith.constant 0 : index
    %56 = vector.load %arg8[%c3, %c0_35, %c0_36] : memref<7x32x32xbf16, #tpu.memory_space<vmem>>, vector<1x32x32xbf16>
    %57 = vector.shape_cast %56 : vector<1x32x32xbf16> to vector<32x32xbf16>
    %cst_37 = arith.constant dense<0.000000e+00> : vector<16x32xf32>
    %58 = tpu.matmul %55, %57, %cst_37 {dimension_numbers = #tpu.dot_dimension_numbers<[1], [0], [0], [1], [0, 0, 1, 1], [], []>} : vector<16x32xbf16>, vector<32x32xbf16>, vector<16x32xf32> -> vector<16x32xf32>
    %59 = arith.addf %54, %58 : vector<16x32xf32>
    %60 = arith.truncf %50 : vector<16x32xf32> to vector<16x32xbf16>
    %c4 = arith.constant 4 : index
    %c0_38 = arith.constant 0 : index
    %c0_39 = arith.constant 0 : index
    %61 = vector.load %arg8[%c4, %c0_38, %c0_39] : memref<7x32x32xbf16, #tpu.memory_space<vmem>>, vector<1x32x32xbf16>
    %62 = vector.shape_cast %61 : vector<1x32x32xbf16> to vector<32x32xbf16>
    %cst_40 = arith.constant dense<0.000000e+00> : vector<16x32xf32>
    %63 = tpu.matmul %60, %62, %cst_40 {dimension_numbers = #tpu.dot_dimension_numbers<[1], [0], [0], [1], [0, 0, 1, 1], [], []>} : vector<16x32xbf16>, vector<32x32xbf16>, vector<16x32xf32> -> vector<16x32xf32>
    %64 = arith.addf %59, %63 : vector<16x32xf32>
    %c2_41 = arith.constant 2 : index
    %c0_42 = arith.constant 0 : index
    %65 = vector.load %arg9[%c2_41, %c0_42] : memref<5x32xf32, #tpu.memory_space<vmem>>, vector<1x32xf32>
    %66 = vector.broadcast %65 : vector<1x32xf32> to vector<16x32xf32>
    %67 = arith.addf %64, %66 : vector<16x32xf32>
    %cst_43 = arith.constant 0.000000e+00 : f32
    %68 = vector.broadcast %cst_43 : f32 to vector<16x32xf32>
    %69 = arith.maximumf %67, %68 : vector<16x32xf32>
    %70 = arith.truncf %69 : vector<16x32xf32> to vector<16x32xbf16>
    %c5 = arith.constant 5 : index
    %c0_44 = arith.constant 0 : index
    %c0_45 = arith.constant 0 : index
    %71 = vector.load %arg8[%c5, %c0_44, %c0_45] : memref<7x32x32xbf16, #tpu.memory_space<vmem>>, vector<1x32x32xbf16>
    %72 = vector.shape_cast %71 : vector<1x32x32xbf16> to vector<32x32xbf16>
    %cst_46 = arith.constant dense<0.000000e+00> : vector<16x32xf32>
    %73 = tpu.matmul %70, %72, %cst_46 {dimension_numbers = #tpu.dot_dimension_numbers<[1], [0], [0], [1], [0, 0, 1, 1], [], []>} : vector<16x32xbf16>, vector<32x32xbf16>, vector<16x32xf32> -> vector<16x32xf32>
    %c3_47 = arith.constant 3 : index
    %c0_48 = arith.constant 0 : index
    %74 = vector.load %arg9[%c3_47, %c0_48] : memref<5x32xf32, #tpu.memory_space<vmem>>, vector<1x32xf32>
    %75 = vector.broadcast %74 : vector<1x32xf32> to vector<16x32xf32>
    %76 = arith.addf %73, %75 : vector<16x32xf32>
    %c0_49 = arith.constant 0 : index
    %c0_50 = arith.constant 0 : index
    %77 = vector.load %arg2[%c0_49, %c0_50] : memref<24x32xbf16, #tpu.memory_space<vmem>>, vector<24x32xbf16>
    %c6 = arith.constant 6 : index
    %c0_51 = arith.constant 0 : index
    %c0_52 = arith.constant 0 : index
    %78 = vector.load %arg8[%c6, %c0_51, %c0_52] : memref<7x32x32xbf16, #tpu.memory_space<vmem>>, vector<1x32x32xbf16>
    %79 = vector.shape_cast %78 : vector<1x32x32xbf16> to vector<32x32xbf16>
    %cst_53 = arith.constant dense<0.000000e+00> : vector<24x32xf32>
    %80 = tpu.matmul %77, %79, %cst_53 {dimension_numbers = #tpu.dot_dimension_numbers<[1], [0], [0], [1], [0, 0, 1, 1], [], []>} : vector<24x32xbf16>, vector<32x32xbf16>, vector<24x32xf32> -> vector<24x32xf32>
    %c4_54 = arith.constant 4 : index
    %c0_55 = arith.constant 0 : index
    %81 = vector.load %arg9[%c4_54, %c0_55] : memref<5x32xf32, #tpu.memory_space<vmem>>, vector<1x32xf32>
    %82 = vector.broadcast %81 : vector<1x32xf32> to vector<24x32xf32>
    %83 = arith.addf %80, %82 : vector<24x32xf32>
    %c0_56 = arith.constant 0 : index
    %c0_57 = arith.constant 0 : index
    %84 = vector.load %arg6[%c0_56, %c0_57] : memref<24x1xi32, #tpu.memory_space<vmem>>, vector<24x1xi32>
    %85 = tpu.iota {dimensions = array<i32: 1>} : vector<24x16xi32>
    %86 = vector.broadcast %84 : vector<24x1xi32> to vector<24x16xi32>
    %87 = arith.cmpi eq, %86, %85 : vector<24x16xi32>
    %88 = arith.extui %87 : vector<24x16xi1> to vector<24x16xi32>
    %89 = arith.sitofp %88 : vector<24x16xi32> to vector<24x16xf32>
    %c0_58 = arith.constant 0 : index
    %c0_59 = arith.constant 0 : index
    %90 = vector.load %arg7[%c0_58, %c0_59] : memref<1x24xi32, #tpu.memory_space<vmem>>, vector<1x24xi32>
    %91 = tpu.iota {dimensions = array<i32: 0>} : vector<16x24xi32>
    %92 = vector.broadcast %90 : vector<1x24xi32> to vector<16x24xi32>
    %93 = arith.cmpi eq, %92, %91 : vector<16x24xi32>
    %94 = arith.extui %93 : vector<16x24xi1> to vector<16x24xi32>
    %95 = arith.sitofp %94 : vector<16x24xi32> to vector<16x24xf32>
    %cst_60 = arith.constant dense<0.000000e+00> : vector<24x32xf32>
    %96 = tpu.matmul %89, %76, %cst_60 {dimension_numbers = #tpu.dot_dimension_numbers<[1], [0], [0], [1], [0, 0, 1, 1], [], []>} : vector<24x16xf32>, vector<16x32xf32>, vector<24x32xf32> -> vector<24x32xf32>
    %97 = arith.addf %96, %83 : vector<24x32xf32>
    %cst_61 = arith.constant dense<0.000000e+00> : vector<16xf32>
    %98 = vector.multi_reduction <add>, %95, %cst_61 [1] : vector<16x24xf32> to vector<16xf32>
    %99 = vector.shape_cast %98 : vector<16xf32> to vector<16x1xf32>
    %cst_62 = arith.constant dense<0.000000e+00> : vector<16x32xf32>
    %100 = tpu.matmul %95, %97, %cst_62 {dimension_numbers = #tpu.dot_dimension_numbers<[1], [0], [0], [1], [0, 0, 1, 1], [], []>} : vector<16x24xf32>, vector<24x32xf32>, vector<16x32xf32> -> vector<16x32xf32>
    %cst_63 = arith.constant 1.000000e+00 : f32
    %101 = vector.broadcast %cst_63 : f32 to vector<16x1xf32>
    %102 = arith.maximumf %99, %101 : vector<16x1xf32>
    %103 = vector.broadcast %102 : vector<16x1xf32> to vector<16x32xf32>
    %104 = arith.divf %100, %103 : vector<16x32xf32>
    %cst_64 = arith.constant 0.949999988 : f32
    %105 = vector.broadcast %cst_64 : f32 to vector<16x32xf32>
    %106 = arith.mulf %105, %104 : vector<16x32xf32>
    %cst_65 = arith.constant 5.000000e-02 : f32
    %107 = vector.broadcast %cst_65 : f32 to vector<16x32xf32>
    %108 = arith.mulf %107, %76 : vector<16x32xf32>
    %109 = arith.addf %106, %108 : vector<16x32xf32>
    %cst_66 = arith.constant 0.000000e+00 : f32
    %110 = vector.broadcast %cst_66 : f32 to vector<16x32xf32>
    %111 = arith.maximumf %109, %110 : vector<16x32xf32>
    %c0_67 = arith.constant 0 : index
    %c0_68 = arith.constant 0 : index
    %112 = vector.load %arg11[%c0_67, %c0_68] : memref<16x32xf32, #tpu.memory_space<vmem>>, vector<16x32xf32>
    tpu.vector_store %arg11[%c0_67, %c0_68], %111 {strides = array<i32>} : memref<16x32xf32, #tpu.memory_space<vmem>>, vector<16x32xf32>,
    return
  }
}

</mosaic_0001>

<bundles_post_ra>
// kernel: gnn_block_forward.1
= control target key start
LH: loop header
LB: loop body
LE: loop exit
PB: predicated region body
PF: predicated region fallthrough
CT: control target
= control target key end

     0   :  { %17 = vsyncpa [#allocation3], 0  ;;  %v1455_v1 = vmov 0.0   ;;  %vm1456_vm0 = vmmov 0   ;;  %v1457_v4 = vmov 0   ;;  %vm62_vm1 = vcmask 261120   ;;  %s1721_s0 = inlined_call_operand.vmem [shape: bf16[8,32], index: 0, kind: input, shape index: {}]   ;;  %s1722_s1 = inlined_call_operand.vmem [shape: bf16[16,32], index: 1, kind: input, shape index: {}]   ;;  %s1723_s2 = inlined_call_operand.vmem [shape: bf16[24,32], index: 2, kind: input, shape index: {}]   ;;  %s1724_s3 = inlined_call_operand.vmem [shape: s32[16,1], index: 3, kind: input, shape index: {}]   ;;  %s1725_s4 = inlined_call_operand.vmem [shape: s32[16,1], index: 4, kind: input, shape index: {}]   ;;  %s1726_s5 = inlined_call_operand.vmem [shape: s32[1,16], index: 5, kind: input, shape index: {}]   ;;  %s1727_s6 = inlined_call_operand.vmem [shape: s32[24,1], index: 6, kind: input, shape index: {}]   ;;  %s1728_s7 = inlined_call_operand.vmem [shape: s32[1,24], index: 7, kind: input, shape index: {}]   ;;  %s1729_s8 = inlined_call_operand.vmem [shape: bf16[7,32,32], index: 8, kind: input, shape index: {}]   ;;  %s1730_s9 = inlined_call_operand.vmem [shape: f32[5,32], index: 9, kind: input, shape index: {}]   ;;  %s1731_s10 = inlined_call_operand.hbm [shape: f32[8,32], index: 10, kind: output, shape index: {0}]   ;;  %s1732_s11 = inlined_call_operand.hbm [shape: f32[16,32], index: 11, kind: output, shape index: {1}]  }
   0x1   :  { %v1387_v0 = vld [vmem:[%s1729_s8 + $0x8] sm:$0xff]   ;;  %1278 = vmatprep.subr.bf16.mxu0 %v1455_v1  ;;  %1286 = vmatprep.subr.bf16.mxu1 %v1455_v1  ;;  %v1388_v2 = vld [vmem:[%s1729_s8] sm:$0xff]   ;;  %v1389_v8 = vld [vmem:[%s1729_s8 + $0x18] sm:$0xff]  }
   0x2   :  { %1279 = vmatpush3.bf16.msra.mxu0 %v1387_v0  ;;  %1282 = vmatprep.mubr.msk.bf16.mxu0 %vm1456_vm0, %v1455_v1  ;;  %v179_v3 = vld [vmem:[%s1724_s3] sm:$0xff]  ;;  %v180_v6 = vld [vmem:[%s1724_s3 + $0x8] sm:$0xff]  ;;  %v1390_v10 = vld [vmem:[%s1729_s8 + $0x10] sm:$0xff]  }
   0x3   :  { %1280 = vmatprep.subr.bf16.mxu0 %v1455_v1  ;;  %1385 = vset.pattern.permute.xlu0 %v1457_v4  ;;  %v40_v5 = vld [vmem:[%s1721_s0] sm:$0xf]  ;;  %v196_v7 = vld [vmem:[%s1725_s4 + $0x8] sm:$0xff] }
   0x4   :  { %184 = vperm.xlu0 %1385, %v179_v3   ;;  %1290 = vmatprep.mubr.msk.bf16.mxu1 %vm1456_vm0, %v1455_v1  ;;  %v899_v9 = vld [vmem:[%s1727_s6] sm:$0xff] }
   0x5   :  { %1386 = vset.pattern.permute.xlu1 %v1457_v4  ;;  %1287 = vmatpush3.bf16.msra.mxu1 %v1389_v8  ;;  %v1391_v11 = vld [vmem:[%s1722_s1] sm:$0xff]  }
   0x6   :  { %1281 = vmatpush3.bf16.msra.mxu0 %v1388_v2  ;;  %1288 = vmatprep.subr.bf16.mxu1 %v1455_v1 }
   0x8   :  { %187 = vperm.xlu0 %1385, %v180_v6  }
   0x9   :  { %1283 = vmatmul.mubr.msk.bf16.vlgmr.msra.gmra.mxu0 %vm62_vm1, %v40_v5  ;;  %1289 = vmatpush3.bf16.msra.mxu1 %v1390_v10 }
   0xc   :  { %201 = vperm.xlu0 %1385, %v196_v7  }
   0xd   :  { %18 = vsyncpa [#allocation5], 0  ;;  %1299 = vmatprep.subr.mxu1 %v1455_v1  ;;  %v900_v12 = vld [vmem:[%s1727_s6 + $0x8] sm:$0xff]  ;;  %1291 = vmatmul.mubr.msk.bf16.vlgmr.msra.gmra.mxu1 %vm62_vm1, %v1391_v11  ;;  %v901_v13 = vld [vmem:[%s1727_s6 + $0x10] sm:$0xff]  ;;  %v181_v14 = vlaneseq  ;;  %vm219_vm2 = vcmask 64512   ;;  %vm301_vm6 = vcmask 130048  }
   0xe   :  { %1303 = vmatprep.mubr.msk.f32.mxu1 %vm1456_vm0, %v1455_v1  ;;  %v1155_v18 = vld [vmem:[%s1730_s9] ss:$0 sm:$0xff]  ;;  %v1163_v35 = vld [vmem:[%s1730_s9 + $0x1] ss:$0 sm:$0xff]  ;;  %v1392_v55 = vld [vmem:[%s1729_s8 + $0x38] sm:$0xff]   ;;  %vm1021_vm14 = vcmask 195584  }
   0xf   :  { %v1571_v15 = vand.u32 127, %v181_v14  ;;  %v1583_v30 = vshrl.u32 %v181_v14, 7  ;;  %v1172_v31 = vld [vmem:[%s1726_s5] ss:$0 sm:$0xff]  ;;  %v1395_v57 = vld [vmem:[%s1729_s8 + $0x28] sm:$0xff]   ;;  %v1393_v58 = vld [vmem:[%s1729_s8 + $0x30] sm:$0xff]  }
  0x10   :  { %903 = vperm.xlu0 %1385, %v899_v9   ;;  %v195_v34 = vld [vmem:[%s1725_s4] sm:$0xff]  ;;  %v1396_v60 = vld [vmem:[%s1729_s8 + $0x48] sm:$0xff]   ;;  %v1399_v10 = vld [vmem:[%s1729_s8 + $0x58] sm:$0xff]   ;;  %s1458_s30 = smov [#allocation2]  }
  0x11   :  { %vm216_vm5 = vcmp.eq.s32.totalorder %v1172_v31, %v1583_v30  ;;  %v1394_v59 = vld [vmem:[%s1722_s1] sm:$0xff]   ;;  %v1400_v11 = vld [vmem:[%s1729_s8 + $0x50] sm:$0xff]   ;;  %s1131_s12 = sshll.u32 %s1458_s30, 4  ;;  %s1132_s12 = int_to_ptr.vmem [resolvable:$true] %s1131_s12 }
  0x12   :  { %v1173_v32 = vsel %vm216_vm5, 1.0, %v1455_v1  ;;  %v1397_v61 = vld [vmem:[%s1729_s8 + $0x20] sm:$0xff]   ;;  %p1416_p1 = scmp.lt.s32.totalorder %s1132_s12, %s1132_s12 }
  0x13   :  { %v302_v33 = vsel %vm301_vm6, %v1173_v32, 0.0  ;;  %v1398_v62 = vld [vmem:[%s1729_s8 + $0x40] sm:$0xff]  }
  0x14   :  { %906 = vperm.xlu0 %1385, %v900_v12   ;;  %303 = vadd.xlane.f32.xlu1 %v302_v33  ;;  %v1401_v12 = vld [vmem:[%s1729_s8 + $0x68] sm:$0xff]   ;;  %v1402_v33 = vld [vmem:[%s1729_s8 + $0x60] sm:$0xff]  }
  0x18   :  { %909 = vperm.xlu0 %1385, %v901_v13  }
  0x25   :  { %198 = vperm.xlu1 %1386, %v195_v34   ;;  %v1403_v34 = vld [vmem:[%s1723_s2] sm:$0xff]  }
  0x7f   :  { %v185_v16 = vpop.permute.xlu0 %184 }
  0x80   :  { %vm189_vm3 = vcmp.eq.s32.totalorder %v185_v16, %v1571_v15 }
  0x81   :  { %v1168_v17 = vsel %vm189_vm3, 1.0, %v1455_v1 }
  0x82   :  { %1296 = vmatprep.mubr.msk.f32.mxu0 %vm219_vm2, %v1168_v17 }
  0x83   :  { %v188_v19 = vpop.permute.xlu0 %187 }
  0x84   :  { %vm190_vm4 = vcmp.eq.s32.totalorder %v188_v19, %v1571_v15 }
  0x85   :  { %v1169_v23 = vsel %vm190_vm4, 1.0, %v1455_v1 }
  0x87   :  { %v202_v53 = vpop.permute.xlu0 %201 }
  0x88   :  { %vm204_vm8 = vcmp.eq.s32.totalorder %v202_v53, %v1571_v15  ;;  %v921_v53 = vadd.s32 8, %v1583_v30 }
  0x89   :  { %v1171_v56 = vsel %vm204_vm8, 1.0, %v1455_v1 }
  0x9d   :  { %v304_v42 = vpop.xlane.xlu1 %303 }
  0x9e   :  { %v378_v45 = vmax.f32 %v304_v42, 1.0 }
  0xa0   :  { %1405 = vrcp.f32 %v378_v45 }
  0xa1   :  { %v199_v43 = vpop.permute.xlu1 %198 }
  0xa2   :  { %vm203_vm7 = vcmp.eq.s32.totalorder %v199_v43, %v1571_v15 }
  0xa3   :  { %v1170_v44 = vsel %vm203_vm7, 1.0, %v1455_v1 }
  0xad   :  { %v1406_v46 = vpop.eup %1405 }
  0xc9   :  { %v100_v20 = vpop.f32.mrf.mxu0 }
  0xca   :  { %v101_v21 = vadd.f32 %v1155_v18, %v100_v20  ;;  %v1203_v20 = vld [vmem:[%s1730_s9 + $0x2] ss:$0 sm:$0xff] }
  0xcb   :  { %v1284_v22 = vpop.f32.mrf.mxu0 }
  0xcc   :  { %1294 = vmatprep.subr.mxu0 %v101_v21  ;;  %v382_v51 = vmul.f32 0.05, %v101_v21 }
  0xcd   :  { %v103_v24 = vpop.f32.mrf.mxu0  ;;  %1295 = vmatpush3.msra.mxu0 %v101_v21  ;;  %v172_v26 = vpop.f32.mrf.mxu1 }
  0xce   :  { %1297 = vmatmul.mubr.msk.f32.vlgmr.msra.gmra.mxu0 %vm219_vm2, %v1169_v23  ;;  %v173_v38 = vadd.f32 %v1163_v35, %v172_v26 }
  0xcf   :  { %v1285_v25 = vpop.f32.mrf.mxu0  ;;  %1308 = vmatprep.mubr.msk.f32.mxu0 %vm219_vm2, %v1168_v17  ;;  %v1292_v27 = vpop.f32.mrf.mxu1 }
  0xd1   :  { %v175_v28 = vpop.f32.mrf.mxu1 }
  0xd2   :  { %v176_v36 = vadd.f32 %v1163_v35, %v175_v28  ;;  %v1404_v35 = vld [vmem:[%s1723_s2 + $0x8] ss:$0 sps:$4 sm:$0xff]  }
  0xd3   :  { %v1293_v29 = vpop.f32.mrf.mxu1 }
 0x18e   :  { %v1298_v37 = vpop.f32.mrf.mxu0 }
 0x18f   :  { %v298_v39 = vadd.f32 %v1298_v37, %v176_v36  ;;  %v904_v36 = vpop.permute.xlu0 %903 }
 0x190   :  { %v292_v40 = vpop.f32.mrf.mxu0  ;;  %vm911_vm9 = vcmp.eq.s32.totalorder %v904_v36, %v1571_v15 }
 0x191   :  { %v293_v41 = vadd.f32 %v292_v40, %v173_v38  ;;  %1300 = vmatpush3.msra.mxu1 %v298_v39  ;;  %v1208_v39 = vld [vmem:[%s1730_s9 + $0x3] ss:$0 sm:$0xff]  ;;  %v1223_v45 = vsel %vm911_vm9, 1.0, %v1455_v1 }
 0x192   :  { %1301 = vmatprep.subr.mxu1 %v1455_v1 }
 0x193   :  { %1302 = vmatpush3.msra.mxu1 %v293_v41  ;;  %v907_v41 = vpop.permute.xlu0 %906 }
 0x194   :  { %1304 = vmatmul.mubr.msk.f32.vlgmr.msra.gmra.mxu1 %vm301_vm6, %v1173_v32  ;;  %vm912_vm10 = vcmp.eq.s32.totalorder %v907_v41, %v1571_v15 }
 0x195   :  { %1313 = vmatprep.mubr.msk.f32.mxu1 %vm219_vm2, %v1170_v44 }
 0x254   :  { %v374_v47 = vpop.f32.mrf.mxu1 }
 0x255   :  { %v380_v48 = vmul.f32 %v1406_v46, %v374_v47  ;;  %v910_v46 = vpop.permute.xlu0 %909  ;;  %v1224_v47 = vsel %vm912_vm10, 1.0, %v1455_v1 }
 0x256   :  { %v1305_v49 = vpop.f32.mrf.mxu1  ;;  %vm913_vm11 = vcmp.eq.s32.totalorder %v910_v46, %v1571_v15 }
 0x257   :  { %v381_v50 = vmul.f32 0.95, %v380_v48  ;;  %v1225_v48 = vsel %vm913_vm11, 1.0, %v1455_v1 }
 0x259   :  { %v383_v52 = vadd.f32 %v382_v51, %v381_v50 }
 0x25b   :  { %v384_v54 = vmax.f32 %v383_v52, 0.0  ;;  %v1226_v52 = vld [vmem:[%s1728_s7] ss:$0 sm:$0xff] }
 0x25c   :  { %vm926_vm12 = vcmp.eq.s32.totalorder %v1226_v52, %v1583_v30  ;;  %vm927_vm13 = vcmp.eq.s32.totalorder %v1226_v52, %v921_v53  ;;  %v1216_v30 = vld [vmem:[%s1730_s9 + $0x4] ss:$0 sm:$0xff]  ;;  %s1411_s9 = scalar_lea.vmem %s1132_s12, 128 }
 0x25d   :  { %385 = vst.msk [vmem:[#allocation2] sm:$0xff] %vm62_vm1, %v384_v54  ;;  %1306 = vmatprep.subr.mxu0 %v384_v54  ;;  %1311 = vmatprep.subr.mxu1 %v384_v54  ;;  %v1227_v15 = vsel %vm926_vm12, 1.0, %v1455_v1  ;;  %p1412_p0 = scmp.ne.s32.totalorder %s1132_s12, %s1411_s9  ;;  %p1417_p2 = scmp.lt.s32.totalorder %s1411_s9, %s1411_s9 }
 0x25e   :  { %1307 = vmatpush3.msra.mxu0 %v384_v54  ;;  %1312 = vmatpush3.msra.mxu1 %v384_v54  ;;  %v1228_v54 = vsel %vm927_vm13, 1.0, %v1455_v1 }
 0x25f   :  { %1309 = vmatmul.mubr.msk.f32.vlgmr.msra.gmra.mxu0 %vm219_vm2, %v1169_v23  ;;  %1314 = vmatmul.mubr.msk.f32.vlgmr.msra.gmra.mxu1 %vm219_vm2, %v1171_v56  ;;  %v1022_v56 = vsel %vm1021_vm14, %v1227_v15, 0.0  ;;  %p1418_p3 = por %p1417_p2, %p1416_p1 }
 0x260   :  { %1316 = vmatprep.subr.bf16.mxu0 %v1455_v1  ;;  %1320 = vmatprep.mubr.msk.bf16.mxu0 %vm1456_vm0, %v1455_v1 }
 0x261   :  { %1317 = vmatpush3.bf16.msra.mxu0 %v1392_v55  ;;  %1324 = vmatprep.subr.bf16.mxu1 %v1455_v1  ;;  %v1025_v55 = vsel %vm1021_vm14, %v1228_v54, 0.0  ;;  %p1419_p4 = pnand %p1418_p3, %p1412_p0 }
 0x262   :  { %1318 = vmatprep.subr.bf16.mxu0 %v1455_v1  ;;  %1325 = vmatpush3.bf16.msra.mxu1 %v1395_v57 }
 0x263   :  { %1326 = vmatprep.subr.bf16.mxu1 %v1455_v1  ;;  %1328 = vmatprep.mubr.msk.bf16.mxu1 %vm1456_vm0, %v1455_v1 }
 0x264   :  { %1026 = vadd.xlane.f32.xlu0 %v1025_v55  ;;  %1023 = vadd.xlane.f32.xlu1 %v1022_v56 }
 0x265   :  { %1319 = vmatpush3.bf16.msra.mxu0 %v1393_v58 }
 0x266   :  { %1332 = vmatprep.subr.bf16.mxu0 %v1455_v1  ;;  %1327 = vmatpush3.bf16.msra.mxu1 %v1397_v61 }
 0x267   :  { %1340 = vmatprep.subr.bf16.mxu1 %v1455_v1 }
 0x268   :  { %1321 = vmatmul.mubr.msk.bf16.vlgmr.msra.gmra.mxu0 %vm62_vm1, %v1394_v59 }
 0x269   :  { %1333 = vmatpush3.bf16.msra.mxu0 %v1396_v60  ;;  %1336 = vmatprep.mubr.msk.bf16.mxu0 %vm1456_vm0, %v1455_v1 }
 0x26a   :  { %1334 = vmatprep.subr.bf16.mxu0 %v1455_v1 }
 0x26d   :  { %1335 = vmatpush3.bf16.msra.mxu0 %v1398_v62 }
 0x26e   :  { %1348 = vmatprep.subr.bf16.mxu0 %v1401_v12 }
 0x31f   :  { %v1310_v63 = vpop.f32.mrf.mxu0  ;;  %v1315_v0 = vpop.f32.mrf.mxu1 }
 0x321   :  { %v452_v2 = vpop.f32.mrf.mxu0  ;;  %v533_v3 = vpop.f32.mrf.mxu1 }
 0x322   :  { %v542_v4 = vpack.c.bf16 %v1310_v63, %v452_v2  ;;  %v672_v5 = vpack.c.bf16 %v1315_v0, %v533_v3 }
 0x324   :  { %1329 = vmatmul.mubr.msk.bf16.vlgmr.msra.gmra.mxu1 %vm62_vm1, %v542_v4  ;;  %1337 = vmatmul.mubr.msk.bf16.vlgmr.msra.gmra.mxu0 %vm62_vm1, %v672_v5 }
 0x325   :  { %1344 = vmatprep.mubr.msk.bf16.mxu1 %vm1456_vm0, %v1455_v1  ;;  %1341 = vmatpush3.bf16.msra.mxu1 %v1399_v10 }
 0x326   :  { %1342 = vmatprep.subr.bf16.mxu1 %v1455_v1  ;;  %1349 = vmatpush3.bf16.msra.mxu0 %v1401_v12 }
 0x327   :  { %1350 = vmatprep.subr.bf16.mxu0 %v1402_v33  ;;  %1352 = vmatprep.mubr.msk.bf16.mxu0 %vm62_vm1, %v1403_v34 }
 0x328   :  { %v609_v6 = vpop.f32.mrf.mxu0 }
 0x329   :  { %1343 = vmatpush3.bf16.msra.mxu1 %v1400_v11 }
 0x32a   :  { %v1322_v7 = vpop.f32.mrf.mxu0  ;;  %1356 = vmatprep.subr.mxu1 %v1455_v1  ;;  %1351 = vmatpush3.bf16.msra.mxu0 %v1402_v33 }
 0x32c   :  { %v612_v8 = vpop.f32.mrf.mxu0 }
 0x32d   :  { %1353 = vmatmul.mubr.msk.bf16.vlgmr.msra.gmra.mxu0 %vm62_vm1, %v1404_v35 }
 0x32e   :  { %v1323_v9 = vpop.f32.mrf.mxu0  ;;  %1375 = vmatprep.mubr.msk.f32.mxu0 %vm1021_vm14, %v1227_v15 }
 0x3e4   :  { %v665_v13 = vpop.f32.mrf.mxu1  ;;  %v727_v14 = vpop.f32.mrf.mxu0 }
 0x3e5   :  { %v666_v16 = vadd.f32 %v665_v13, %v609_v6 }
 0x3e6   :  { %v1330_v17 = vpop.f32.mrf.mxu1  ;;  %v1338_v18 = vpop.f32.mrf.mxu0 }
 0x3e7   :  { %v734_v19 = vadd.f32 %v727_v14, %v666_v16 }
 0x3e8   :  { %v668_v21 = vpop.f32.mrf.mxu1  ;;  %v730_v22 = vpop.f32.mrf.mxu0 }
 0x3e9   :  { %v669_v23 = vadd.f32 %v668_v21, %v612_v8  ;;  %v741_v26 = vadd.f32 %v1203_v20, %v734_v19 }
 0x3ea   :  { %v1331_v24 = vpop.f32.mrf.mxu1  ;;  %v1339_v25 = vpop.f32.mrf.mxu0 }
 0x3eb   :  { %v735_v27 = vadd.f32 %v730_v22, %v669_v23  ;;  %v743_v29 = vmax.f32 %v741_v26, 0.0 }
 0x3ed   :  { %v742_v28 = vadd.f32 %v1203_v20, %v735_v27  ;;  %v1354_v49 = vpop.f32.mrf.mxu0 }
 0x3ee   :  { %v894_v62 = vadd.f32 %v1354_v49, %v1216_v30 }
 0x3ef   :  { %v744_v31 = vmax.f32 %v742_v28, 0.0  ;;  %v885_v50 = vpop.f32.mrf.mxu0 }
 0x3f0   :  { %v886_v2 = vadd.f32 %v1216_v30, %v885_v50 }
 0x3f1   :  { %v745_v32 = vpack.c.bf16 %v744_v31, %v743_v29  ;;  %v1355_v51 = vpop.f32.mrf.mxu0 }
 0x3f3   :  { %1345 = vmatmul.mubr.msk.bf16.vlgmr.msra.gmra.mxu1 %vm62_vm1, %v745_v32  ;;  %v888_v59 = vpop.f32.mrf.mxu0 }
 0x3f4   :  { %1360 = vmatprep.mubr.msk.f32.mxu1 %vm1456_vm0, %v1455_v1  ;;  %v889_v63 = vadd.f32 %v1216_v30, %v888_v59 }
 0x4b3   :  { %v805_v37 = vpop.f32.mrf.mxu1 }
 0x4b4   :  { %v1680_v44 = vadd.f32 %v1208_v39, %v805_v37 }
 0x4b5   :  { %v1346_v38 = vpop.f32.mrf.mxu1 }
 0x4b7   :  { %v808_v40 = vpop.f32.mrf.mxu1 }
 0x4b8   :  { %v1677_v42 = vadd.f32 %v1208_v39, %v808_v40 }
 0x4b9   :  { %v1347_v43 = vpop.f32.mrf.mxu1 }
 0x4ba   :  { %1357 = vmatpush3.msra.mxu1 %v1677_v42 }
 0x4bb   :  { %1358 = vmatprep.subr.mxu1 %v1455_v1 }
 0x4bc   :  { %1359 = vmatpush3.msra.mxu1 %v1680_v44 }
 0x4bd   :  { %1361 = vmatmul.mubr.msk.f32.vlgmr.msra.gmra.mxu1 %vm301_vm6, %v1223_v45 }
 0x4be   :  { %1363 = vmatprep.mubr.msk.f32.mxu1 %vm1456_vm0, %v1455_v1 }
 0x4c1   :  { %1364 = vmatmul.mubr.msk.f32.gmra.mxu1 %vm301_vm6, %v1224_v47 }
 0x4c2   :  { %1366 = vmatprep.mubr.msk.f32.mxu1 %vm1456_vm0, %v1455_v1 }
 0x4c5   :  { %1367 = vmatmul.mubr.msk.f32.gmra.mxu1 %vm301_vm6, %v1225_v48 }
 0x57d   :  { %v1007_v57 = vpop.f32.mrf.mxu1 }
 0x57e   :  { %v1008_v5 = vadd.f32 %v1007_v57, %v886_v2 }
 0x57f   :  { %v1362_v58 = vpop.f32.mrf.mxu1 }
 0x581   :  { %v1012_v60 = vpop.f32.mrf.mxu1 }
 0x582   :  { %v1013_v4 = vadd.f32 %v1012_v60, %v889_v63 }
 0x583   :  { %v1365_v61 = vpop.f32.mrf.mxu1 }
 0x585   :  { %v1017_v0 = vpop.f32.mrf.mxu1 }
 0x586   :  { %v1018_v1 = vadd.f32 %v1017_v0, %v894_v62 }
 0x587   :  { %v1368_v3 = vpop.f32.mrf.mxu1 }
 0x588   :  { %1369 = vmatprep.subr.mxu0 %v1018_v1 }
 0x589   :  { %1370 = vmatpush3.msra.mxu0 %v1018_v1 }
 0x58a   :  { %1371 = vmatprep.subr.mxu0 %v1013_v4 }
 0x58b   :  { %1372 = vmatpush3.msra.mxu0 %v1013_v4 }
 0x58c   :  { %1373 = vmatprep.subr.mxu0 %v1008_v5 }
 0x58d   :  { %1374 = vmatpush3.msra.mxu0 %v1008_v5 }
 0x58e   :  { %1376 = vmatmul.mubr.msk.f32.vlgmr.msra.gmra.mxu0 %vm1021_vm14, %v1228_v54 }
 0x58f   :  { %1422 = shalt.err (!%p1419_p4)
}
 0x590   :  { %1134 = dma.vmem_to_hbm [thread:$0]  %s1132_s12, 128, %s1731_s10, [#allocation3]   ;;  %v1027_v6 = vpop.xlane.xlu0 %1026  ;;  %v1024_v7 = vpop.xlane.xlu1 %1023  ;;  %v1118_v16 = vmul.f32 0.05, %v1677_v42  ;;  %v1117_v19 = vmul.f32 0.05, %v1680_v44 }
 0x591   :  { %v1110_v8 = vmax.f32 %v1027_v6, 1.0  ;;  %v1109_v9 = vmax.f32 %v1024_v7, 1.0  ;;  %s1459_s10 = smov [#allocation4]  }
 0x592   :  { %s1140_s14 = sshll.u32 %s1459_s10, 4  ;;  %s1141_s14 = int_to_ptr.vmem [resolvable:$true] %s1140_s14 }
 0x593   :  { %1407 = vrcp.f32 %v1110_v8  ;;  %s1431_s15 = scalar_lea.vmem %s1141_s14, 256  ;;  %p1436_p6 = scmp.lt.s32.totalorder %s1141_s14, %s1141_s14 }
 0x594   :  { %1409 = vrcp.f32 %v1109_v9  ;;  %p1432_p5 = scmp.ne.s32.totalorder %s1141_s14, %s1431_s15  ;;  %p1437_p7 = scmp.lt.s32.totalorder %s1431_s15, %s1431_s15 }
 0x596   :  { %p1438_p8 = por %p1437_p7, %p1436_p6 }
 0x598   :  { %p1439_p9 = pnand %p1438_p8, %p1432_p5 }
 0x5a0   :  { %v1408_v10 = vpop.eup %1407 }
 0x5a1   :  { %v1410_v11 = vpop.eup %1409 }
 0x64e   :  { %v1377_v12 = vpop.f32.mrf.mxu0 }
 0x64f   :  { %v1114_v13 = vmul.f32 %v1408_v10, %v1377_v12 }
 0x650   :  { %v1100_v14 = vpop.f32.mrf.mxu0 }
 0x651   :  { %v1116_v17 = vmul.f32 0.95, %v1114_v13  ;;  %v1112_v18 = vmul.f32 %v1410_v11, %v1100_v14 }
 0x653   :  { %v1120_v20 = vadd.f32 %v1118_v16, %v1116_v17  ;;  %v1115_v21 = vmul.f32 0.95, %v1112_v18 }
 0x655   :  { %v1122_v22 = vmax.f32 %v1120_v20, 0.0  ;;  %v1119_v23 = vadd.f32 %v1117_v19, %v1115_v21 }
 0x657   :  { %1124 = vst.msk [vmem:[#allocation4 + $0x8] sm:$0xff] %vm62_vm1, %v1122_v22  ;;  %v1121_v24 = vmax.f32 %v1119_v23, 0.0 }
 0x659   :  { %1123 = vst.msk [vmem:[#allocation4] sm:$0xff] %vm62_vm1, %v1121_v24 }
 0x65a   :  { %1442 = shalt.err (!%p1439_p9)
}
 0x65b   :  { %s1460_s1 = smov 128   ;;  %s1461_s16 = smov 8  }
 0x65c   :  { %1146 = dma.vmem_to_hbm [thread:$0]  %s1141_s14, 256, %s1732_s11, [#allocation5], %s1460_s1, %s1460_s1, %s1461_s16  }
 0x65d   :  { %1451 = dma.done.wait [#allocation3], 128  }
 0x65e   :  { %1452 = vsyncadd [#allocation3], 4294967168 }
 0x65f   :  { %1453 = dma.done.wait [#allocation5], 256  }
 0x660   :  { %1454 = vsyncadd [#allocation5], 4294967040 }
 0x661   :  { %1153 = vsyncpa [#allocation3], 1 }
 0x662   :  { %1154 = vsyncpa [#allocation5], 1 }

</bundles_post_ra>
